<compile_context>
chip_gen: v7x
topology: tpu7x:2x2x1
jax: 0.10.0
libtpu: 0.0.40
codegen_flags: <defaults>
</compile_context>

<pallas_src>
import jax
import jax.numpy as jnp
from jax.experimental import pallas as pl
from jax.experimental.pallas import tpu as pltpu

NIN = 256
NOUT = 13
NOUT_PAD = 128  # lane-dense weight/bias width (exactly one 128-lane vreg row)


def _linear_kernel(x_ref, wt_ref, b_ref, o_ref):
    # x_ref:  (tm_or_B, nin)      wt_ref: (nin, NOUT_PAD)
    # b_ref:  (1, NOUT_PAD)       o_ref:  (tm_or_B, NOUT)
    acc = jnp.dot(x_ref[...], wt_ref[...],
                  preferred_element_type=jnp.float32)   # MXU, f32 accumulate
    y = acc + b_ref[...]                                # bias add in f32
    # Store only the real 13 columns (masked vst; cost hidden under DMA /
    # fixed overhead).  Avoids a padded HBM slab + separate XLA slice kernel.
    o_ref[...] = y[:, :o_ref.shape[-1]].astype(o_ref.dtype)


def prepare_classifier_params(weight, bias, nout_pad=NOUT_PAD):
    """One-time parameter prep (hoisted out of the per-call path).

    weight: (nout, nin) -> wt_pad: (nin, nout_pad), zero-padded columns
    bias:   (nout,)     -> b_pad:  (1,  nout_pad), zero-padded
    """
    nout, nin = weight.shape
    wt_pad = jnp.zeros((nin, nout_pad), jnp.float32).at[:, :nout].set(
        weight.astype(jnp.float32).T)
    b_pad = jnp.zeros((1, nout_pad), jnp.float32).at[0, :nout].set(
        bias.astype(jnp.float32))
    return wt_pad, b_pad


def classifier_forward(x, wt_pad, b_pad, nout=NOUT, *,
                       tm=1024, single_shot_max_rows=4096):
    """y = x @ W^T + b (nn.Linear semantics). x: (B, nin) -> (B, nout)."""
    B, nin = x.shape
    nout_pad = wt_pad.shape[1]
    out_dtype = x.dtype
    itemsize = jnp.dtype(x.dtype).itemsize

    cost = pl.CostEstimate(
        flops=2 * B * nin * nout_pad,
        bytes_accessed=(B * nin + nin * nout_pad + nout_pad) * itemsize
                       + B * nout * itemsize,
        transcendentals=0)

    if B <= single_shot_max_rows:
        # Resident path: whole arrays in VMEM, no grid / pipeline setup.
        # Right choice on 1-TC v5e/v6e for any batch that fits VMEM, and on
        # v7x for small batches where tiling buys nothing.
        return pl.pallas_call(
            _linear_kernel,
            out_shape=jax.ShapeDtypeStruct((B, nout), out_dtype),
            in_specs=[
                pl.BlockSpec(memory_space=pltpu.MemorySpace.VMEM),
                pl.BlockSpec(memory_space=pltpu.MemorySpace.VMEM),
                pl.BlockSpec(memory_space=pltpu.MemorySpace.VMEM),
            ],
            out_specs=pl.BlockSpec(memory_space=pltpu.MemorySpace.VMEM),
            cost_estimate=cost,
        )(x, wt_pad, b_pad)

    # Large-batch path: M-tiled, "parallel" grid (shards across v7x's two
    # TensorCores).  pl.cdiv handles non-divisible B (partial last block is
    # read padded / write masked — harmless for a row-wise linear).
    grid = (pl.cdiv(B, tm),)
    return pl.pallas_call(
        _linear_kernel,
        out_shape=jax.ShapeDtypeStruct((B, nout), out_dtype),
        grid_spec=pl.GridSpec(
            grid=grid,
            in_specs=[
                pl.BlockSpec((tm, nin), lambda i: (i, 0)),
                pl.BlockSpec((nin, nout_pad), lambda i: (0, 0)),
                pl.BlockSpec((1, nout_pad), lambda i: (0, 0)),
            ],
            out_specs=pl.BlockSpec((tm, nout), lambda i: (i, 0)),
        ),
        compiler_params=pltpu.CompilerParams(
            dimension_semantics=("parallel",)),
        cost_estimate=cost,
    )(x, wt_pad, b_pad)


if __name__ == "__main__":
    nin, nout = NIN, NOUT

    key = jax.random.PRNGKey(0)
    kx, kw, kb, kx2 = jax.random.split(key, 4)

    # Deterministic parameter init mimicking nn.Linear default
    # (uniform(-1/sqrt(nin), 1/sqrt(nin))).
    bound = 1.0 / (nin ** 0.5)
    weight = jax.random.uniform(kw, (nout, nin), jnp.float32, -bound, bound)
    bias = jax.random.uniform(kb, (nout,), jnp.float32, -bound, bound)

    # One-time prep (pre-transposed, lane-dense padded parameters).
    wt_pad, b_pad = prepare_classifier_params(weight, bias)

    # Small batch -> single-shot resident-VMEM path.
    batch = 8
    x = jax.random.normal(kx, (batch, nin), jnp.float32)
    fwd = jax.jit(lambda xx: classifier_forward(xx, wt_pad, b_pad))
    y = jax.block_until_ready(fwd(x))
    y_ref = x @ weight.T + bias
    assert y.shape == (batch, nout)
    assert jnp.allclose(y, y_ref, atol=1e-4, rtol=1e-4)

    # Moderate batch, NOT divisible by the tile -> tiled "parallel" path with
    # a partial last block (exercises pl.cdiv grid + masked boundary writes).
    big_batch = 1000
    x_big = jax.random.normal(kx2, (big_batch, nin), jnp.float32)
    fwd_tiled = jax.jit(lambda xx: classifier_forward(
        xx, wt_pad, b_pad, tm=256, single_shot_max_rows=512))
    y_big = jax.block_until_ready(fwd_tiled(x_big))
    y_big_ref = x_big @ weight.T + bias
    assert y_big.shape == (big_batch, nout)
    assert jnp.allclose(y_big, y_big_ref, atol=1e-4, rtol=1e-4)

    print("KERNEL_OK")
</pallas_src>

<mosaic_0001>
module attributes {stable_mosaic.version = 11 : i64} {
  func.func @_linear_kernel(%arg0: memref<8x256xf32, #tpu.memory_space<vmem>>, %arg1: memref<256x128xf32, #tpu.memory_space<vmem>>, %arg2: memref<1x128xf32, #tpu.memory_space<vmem>>, %arg3: memref<8x13xf32, #tpu.memory_space<vmem>>) attributes {dimension_semantics = [], scalar_prefetch = 0 : i64, scratch_operands = 0 : i64, tpu.core_type = #tpu.core_type<tc>} {
    %c0 = arith.constant 0 : index
    %c0_0 = arith.constant 0 : index
    %0 = vector.load %arg0[%c0, %c0_0] : memref<8x256xf32, #tpu.memory_space<vmem>>, vector<8x256xf32>
    %c0_1 = arith.constant 0 : index
    %c0_2 = arith.constant 0 : index
    %1 = vector.load %arg1[%c0_1, %c0_2] : memref<256x128xf32, #tpu.memory_space<vmem>>, vector<256x128xf32>
    %cst = arith.constant dense<0.000000e+00> : vector<8x128xf32>
    %2 = tpu.matmul %0, %1, %cst {dimension_numbers = #tpu.dot_dimension_numbers<[1], [0], [0], [1], [0, 0, 1, 1], [], []>} : vector<8x256xf32>, vector<256x128xf32>, vector<8x128xf32> -> vector<8x128xf32>
    %c0_3 = arith.constant 0 : index
    %c0_4 = arith.constant 0 : index
    %3 = vector.load %arg2[%c0_3, %c0_4] : memref<1x128xf32, #tpu.memory_space<vmem>>, vector<1x128xf32>
    %4 = vector.broadcast %3 : vector<1x128xf32> to vector<8x128xf32>
    %5 = arith.addf %2, %4 : vector<8x128xf32>
    %6 = vector.extract_strided_slice %5 {offsets = [0, 0], sizes = [8, 13], strides = [1, 1]} : vector<8x128xf32> to vector<8x13xf32>
    %c0_5 = arith.constant 0 : index
    %c0_6 = arith.constant 0 : index
    %7 = vector.load %arg3[%c0_5, %c0_6] : memref<8x13xf32, #tpu.memory_space<vmem>>, vector<8x13xf32>
    tpu.vector_store %arg3[%c0_5, %c0_6], %6 {strides = array<i32>} : memref<8x13xf32, #tpu.memory_space<vmem>>, vector<8x13xf32>,
    return
  }
}

</mosaic_0001>

<bundles_post_ra>
// kernel: _lambda_.1
= control target key start
LH: loop header
LB: loop body
LE: loop exit
PB: predicated region body
PF: predicated region fallthrough
CT: control target
= control target key end

     0   :  { %8 = vsyncpa [#allocation3], 0  ;;  %s386_s0 = inlined_call_operand.hbm [shape: f32[8,256], index: 0, kind: input, shape index: {}]   ;;  %s387_s1 = inlined_call_operand.hbm [shape: f32[256,128], index: 1, kind: input, shape index: {}]   ;;  %s388_s2 = inlined_call_operand.vmem [shape: f32[1,128], index: 2, kind: input, shape index: {}]   ;;  %s389_s3 = inlined_call_operand.hbm [shape: f32[8,13], index: 3, kind: output, shape index: {}]  }
   0x1   :  { %9 = vsyncpa [#allocation6], 0 }
   0x2   :  { %10 = vsyncpa [#allocation4], 0  ;;  %s315_s12 = smov [#allocation2]   ;;  %s316_s14 = smov [#allocation5]  }
   0x3   :  { %s17_s13 = sshll.u32 %s315_s12, 4  ;;  %s26_s15 = sshll.u32 %s316_s14, 4  ;;  %s18_s13 = int_to_ptr.vmem [resolvable:$true] %s17_s13  ;;  %s340_s15 = int_to_ptr.vmem [resolvable:$true] %s26_s15 }
   0x4   :  { %s243_s18 = scalar_lea.hbm %s386_s0, 256 }
   0x5   :  { %p244_p0 = scmp.ne.s32.totalorder %s386_s0, %s243_s18  ;;  %p247_p1 = scmp.lt.u32.totalorder %s243_s18, %s386_s0 }
   0x7   :  { %p249_p2 = pnand %p247_p1, %p244_p0 }
   0x9   :  { %252 = shalt.err (!%p249_p2)
}
   0xa   :  { %s253_s23 = scalar_lea.vmem %s18_s13, 256  ;;  %p258_p4 = scmp.lt.s32.totalorder %s18_s13, %s18_s13 }
   0xb   :  { %p254_p3 = scmp.ne.s32.totalorder %s18_s13, %s253_s23  ;;  %p259_p5 = scmp.lt.s32.totalorder %s253_s23, %s253_s23 }
   0xd   :  { %p260_p6 = por %p259_p5, %p258_p4 }
   0xf   :  { %p261_p7 = pnand %p260_p6, %p254_p3 }
  0x11   :  { %264 = shalt.err (!%p261_p7)
}
  0x12   :  { %20 = dma.hbm_to_vmem [thread:$0]  %s386_s0, 256, %s18_s13, [#allocation3]  }
  0x13   :  { %s265_s28 = scalar_lea.hbm %s387_s1, 4096 }
  0x14   :  { %p266_p8 = scmp.ne.s32.totalorder %s387_s1, %s265_s28  ;;  %p269_p9 = scmp.lt.u32.totalorder %s265_s28, %s387_s1 }
  0x16   :  { %p271_p10 = pnand %p269_p9, %p266_p8 }
  0x18   :  { %274 = shalt.err (!%p271_p10)
}
  0x19   :  { %s275_s6 = scalar_lea.vmem %s340_s15, 4096  ;;  %p280_p12 = scmp.lt.s32.totalorder %s340_s15, %s340_s15 }
  0x1a   :  { %p276_p11 = scmp.ne.s32.totalorder %s340_s15, %s275_s6  ;;  %p281_p13 = scmp.lt.s32.totalorder %s275_s6, %s275_s6 }
  0x1c   :  { %p282_p0 = por %p281_p13, %p280_p12 }
  0x1e   :  { %p283_p1 = pnand %p282_p0, %p276_p11 }
  0x20   :  { %286 = shalt.err (!%p283_p1)
}
  0x21   :  { %s317_s0 = smov 128   ;;  %s318_s7 = smov 8  }
  0x22   :  { %32 = dma.hbm_to_vmem [thread:$0]  %s387_s1, 4096, %s340_s15, [#allocation6], %s317_s0, %s317_s0, %s318_s7  }
  0x23   :  { %309 = dma.done.wait [#allocation3], 256  }
  0x24   :  { %310 = vsyncadd [#allocation3], 4294967040 }
  0x25   :  { %311 = dma.done.wait [#allocation6], 4096  }
  0x26   :  { %312 = vsyncadd [#allocation6], 4294963200  ;;  %v59_v0 = vld [vmem:[#allocation5 + $0x80] sm:$0xff]  ;;  %v60_v1 = vld [vmem:[#allocation5 + $0x88] sm:$0xff]  ;;  %s319_s11 = smov [#allocation7]   ;;  %vm152_vm0 = vcmask 105472  }
  0x27   :  { %v43_v2 = vld [vmem:[#allocation5] sm:$0xff]  ;;  %v206_v3 = vpack.c.bf16 %v60_v1, %v59_v0  ;;  %v44_v4 = vld [vmem:[#allocation5 + $0x8] sm:$0xff]  ;;  %v61_v5 = vld [vmem:[#allocation5 + $0x90] sm:$0xff]  ;;  %s160_s12 = sshll.u32 %s319_s11, 4  ;;  %s161_s12 = int_to_ptr.vmem [resolvable:$true] %s160_s12 }
  0x28   :  { %v62_v6 = vld [vmem:[#allocation5 + $0x98] sm:$0xff]  ;;  %v208_v7 = vpack.c.bf16 %v44_v4, %v43_v2  ;;  %v45_v9 = vld [vmem:[#allocation5 + $0x10] sm:$0xff]  ;;  %v63_v11 = vld [vmem:[#allocation5 + $0xa0] sm:$0xff]  ;;  %s287_s13 = scalar_lea.vmem %s161_s12, 128  ;;  %p292_p3 = scmp.lt.s32.totalorder %s161_s12, %s161_s12 }
  0x29   :  { %v210_v8 = vpack.c.bf16 %v62_v6, %v61_v5  ;;  %v46_v10 = vld [vmem:[#allocation5 + $0x18] sm:$0xff]  ;;  %207 = vmatprep.subr.bf16.mxu0 %v206_v3  ;;  %v64_v12 = vld [vmem:[#allocation5 + $0xa8] sm:$0xff]  ;;  %v47_v15 = vld [vmem:[#allocation5 + $0x20] sm:$0xff]  ;;  %p288_p2 = scmp.ne.s32.totalorder %s161_s12, %s287_s13  ;;  %p293_p4 = scmp.lt.s32.totalorder %s287_s13, %s287_s13 }
  0x2a   :  { %209 = vmatpush3.bf16.msra.mxu0 %v208_v7  ;;  %v212_v13 = vpack.c.bf16 %v46_v10, %v45_v9  ;;  %v214_v14 = vpack.c.bf16 %v64_v12, %v63_v11  ;;  %v48_v16 = vld [vmem:[#allocation5 + $0x28] sm:$0xff]  ;;  %v65_v17 = vld [vmem:[#allocation5 + $0xb0] sm:$0xff]  ;;  %v66_v18 = vld [vmem:[#allocation5 + $0xb8] sm:$0xff] }
  0x2b   :  { %211 = vmatprep.subr.bf16.mxu0 %v210_v8  ;;  %v216_v19 = vpack.c.bf16 %v48_v16, %v47_v15  ;;  %v218_v20 = vpack.c.bf16 %v66_v18, %v65_v17  ;;  %v49_v21 = vld [vmem:[#allocation5 + $0x30] sm:$0xff]  ;;  %v50_v22 = vld [vmem:[#allocation5 + $0x38] sm:$0xff]  ;;  %v67_v23 = vld [vmem:[#allocation5 + $0xc0] sm:$0xff]  ;;  %p294_p5 = por %p293_p4, %p292_p3 }
  0x2c   :  { %v68_v24 = vld [vmem:[#allocation5 + $0xc8] sm:$0xff]  ;;  %v42_v25 = vld [vmem:[#allocation2 + $0x8] sm:$0xff]  ;;  %v220_v26 = vpack.c.bf16 %v50_v22, %v49_v21  ;;  %v51_v28 = vld [vmem:[#allocation5 + $0x40] sm:$0xff] }
  0x2d   :  { %146 = vmatprep.mubr.f32.mxu0 %v42_v25  ;;  %v222_v27 = vpack.c.bf16 %v68_v24, %v67_v23  ;;  %v52_v29 = vld [vmem:[#allocation5 + $0x48] sm:$0xff]  ;;  %v69_v30 = vld [vmem:[#allocation5 + $0xd0] sm:$0xff]  ;;  %v70_v31 = vld [vmem:[#allocation5 + $0xd8] sm:$0xff]  ;;  %p295_p6 = pnand %p294_p5, %p288_p2 }
  0x2e   :  { %213 = vmatpush3.bf16.msra.mxu0 %v212_v13  ;;  %v224_v32 = vpack.c.bf16 %v52_v29, %v51_v28  ;;  %v226_v33 = vpack.c.bf16 %v70_v31, %v69_v30  ;;  %v53_v34 = vld [vmem:[#allocation5 + $0x50] sm:$0xff]  ;;  %v54_v35 = vld [vmem:[#allocation5 + $0x58] sm:$0xff]  ;;  %v71_v36 = vld [vmem:[#allocation5 + $0xe0] sm:$0xff] }
  0x2f   :  { %215 = vmatprep.subr.bf16.mxu0 %v214_v14  ;;  %v72_v37 = vld [vmem:[#allocation5 + $0xe8] sm:$0xff]  ;;  %v228_v38 = vpack.c.bf16 %v54_v35, %v53_v34  ;;  %v55_v40 = vld [vmem:[#allocation5 + $0x60] sm:$0xff]  ;;  %v73_v42 = vld [vmem:[#allocation5 + $0xf0] sm:$0xff] }
  0x30   :  { %v230_v39 = vpack.c.bf16 %v72_v37, %v71_v36  ;;  %v56_v41 = vld [vmem:[#allocation5 + $0x68] sm:$0xff]  ;;  %v74_v43 = vld [vmem:[#allocation5 + $0xf8] sm:$0xff]  ;;  %v57_v46 = vld [vmem:[#allocation5 + $0x70] sm:$0xff] }
  0x31   :  { %v232_v44 = vpack.c.bf16 %v56_v41, %v55_v40  ;;  %v234_v45 = vpack.c.bf16 %v74_v43, %v73_v42  ;;  %v58_v47 = vld [vmem:[#allocation5 + $0x78] sm:$0xff]  ;;  %v41_v49 = vld [vmem:[#allocation2] sm:$0xff] }
  0x32   :  { %217 = vmatpush3.bf16.msra.mxu0 %v216_v19  ;;  %v236_v48 = vpack.c.bf16 %v58_v47, %v57_v46  ;;  %v170_v51 = vld [vmem:[%s388_s2] ss:$0 sm:$0xff] }
  0x33   :  { %219 = vmatprep.subr.bf16.mxu0 %v218_v20 }
  0x36   :  { %221 = vmatpush3.bf16.msra.mxu0 %v220_v26 }
  0x37   :  { %223 = vmatprep.subr.bf16.mxu0 %v222_v27 }
  0x3a   :  { %225 = vmatpush3.bf16.msra.mxu0 %v224_v32 }
  0x3b   :  { %227 = vmatprep.subr.bf16.mxu0 %v226_v33 }
  0x3e   :  { %229 = vmatpush3.bf16.msra.mxu0 %v228_v38 }
  0x3f   :  { %231 = vmatprep.subr.bf16.mxu0 %v230_v39 }
  0x42   :  { %233 = vmatpush3.bf16.msra.mxu0 %v232_v44 }
  0x43   :  { %235 = vmatprep.subr.bf16.mxu0 %v234_v45 }
  0x46   :  { %237 = vmatpush3.bf16.msra.mxu0 %v236_v48 }
  0x49   :  { %147 = vmatmul.mubr.f32.vlgmr.msra.gmra.mrb[0].mxu0 %v41_v49 }
 0x11c   :  { %v203_v50 = vpop.f32.mrb[0].mxu0 }
 0x11d   :  { %v204_v52 = vpop.f32.mrb[1].mxu0 }
 0x11e   :  { %v205_v53 = vadd.f32 %v204_v52, %v203_v50 }
 0x120   :  { %v149_v54 = vadd.f32 %v205_v53, %v170_v51 }
 0x122   :  { %153 = vst.msk [vmem:[#allocation7] sm:$0xff] %vm152_vm0, %v149_v54 }
 0x123   :  { %298 = shalt.err (!%p295_p6)
}
 0x124   :  { %s299_s16 = scalar_lea.hbm %s389_s3, 128 }
 0x125   :  { %p300_p7 = scmp.ne.s32.totalorder %s389_s3, %s299_s16  ;;  %p303_p8 = scmp.lt.u32.totalorder %s299_s16, %s389_s3 }
 0x127   :  { %p305_p9 = pnand %p303_p8, %p300_p7 }
 0x129   :  { %308 = shalt.err (!%p305_p9)
}
 0x12a   :  { %163 = dma.vmem_to_hbm [thread:$0]  %s161_s12, 128, %s389_s3, [#allocation4]  }
 0x12b   :  { %313 = dma.done.wait [#allocation4], 128  }
 0x12c   :  { %314 = vsyncadd [#allocation4], 4294967168 }
 0x12d   :  { %167 = vsyncpa [#allocation3], 1 }
 0x12e   :  { %168 = vsyncpa [#allocation6], 1 }
 0x12f   :  { %169 = vsyncpa [#allocation4], 1 }

</bundles_post_ra>
